<compile_context>
chip_gen: v6e
topology: v6e:2x2x1
jax: 0.10.0
libtpu: 0.0.40
codegen_flags: <defaults>
</compile_context>

<pallas_src>
import jax
import jax.numpy as jnp
from jax.experimental import pallas as pl
from jax.experimental.pallas import tpu as pltpu


def _offset_scale_kernel(x_ref, gamma_ref, beta_ref, *out_refs):
    # x_ref:     (tm, L)  current row tile (read once per tile)
    # gamma_ref: (H, L)   resident scale rows (lane-tiled)
    # beta_ref:  (H, L)   resident offset rows (lane-tiled)
    # out_refs:  H refs of shape (tm, L), one per head
    x = x_ref[...]
    for h, o_ref in enumerate(out_refs):
        g = gamma_ref[pl.ds(h, 1), :]   # (1, L) broadcast over rows
        b = beta_ref[pl.ds(h, 1), :]    # (1, L)
        o_ref[...] = (x * g + b).astype(o_ref.dtype)


def _round_up(a, b):
    return (a + b - 1) // b * b


def offset_scale(x, gamma, beta, *, tm_max=1024, vmem_budget_bytes=12 * 1024 * 1024):
    """x: (..., D), gamma/beta: (H, D). Returns tuple of H arrays of shape (..., D)."""
    *lead, D = x.shape
    H, Dg = gamma.shape
    assert D == Dg, "feature dim mismatch"
    N = 1
    for s in lead:
        N *= s

    # Lane folding: make the lane axis 128-wide when D divides 128.
    if D < 128 and 128 % D == 0:
        k = 128 // D
    else:
        k = 1
    L = k * D

    itemsize = jnp.dtype(x.dtype).itemsize

    # Bounded row tile: double-buffered (x tile + H output tiles) under budget.
    bytes_per_row = 2 * (1 + H) * L * itemsize
    tm = max(8, min(tm_max, vmem_budget_bytes // bytes_per_row))
    tm = (tm // 8) * 8

    M = -(-N // k)                       # rows in folded layout
    tm = min(tm, _round_up(M, 8))        # don't tile bigger than the (padded) data
    M_pad = _round_up(M, tm)

    total = N * D
    flat = x.reshape(total)
    pad = M_pad * L - total
    if pad:
        flat = jnp.pad(flat, (0, pad))
    x2 = flat.reshape(M_pad, L)

    gamma2 = jnp.tile(gamma, (1, k)) if k > 1 else gamma   # (H, L)
    beta2 = jnp.tile(beta, (1, k)) if k > 1 else beta      # (H, L)

    grid = (M_pad // tm,)

    out_shapes = tuple(jax.ShapeDtypeStruct((M_pad, L), x.dtype) for _ in range(H))
    out_specs = tuple(pl.BlockSpec((tm, L), lambda i: (i, 0)) for _ in range(H))

    cost = pl.CostEstimate(
        flops=2 * H * M_pad * L,
        transcendentals=0,
        bytes_accessed=(1 + H) * M_pad * L * itemsize + 2 * H * L * itemsize,
    )

    outs = pl.pallas_call(
        _offset_scale_kernel,
        out_shape=out_shapes,
        grid_spec=pltpu.PrefetchScalarGridSpec(
            num_scalar_prefetch=0,
            grid=grid,
            in_specs=[
                pl.BlockSpec((tm, L), lambda i: (i, 0)),   # x row tile (read once)
                pl.BlockSpec((H, L), lambda i: (0, 0)),    # gamma resident
                pl.BlockSpec((H, L), lambda i: (0, 0)),    # beta resident
            ],
            out_specs=out_specs,
        ),
        compiler_params=pltpu.CompilerParams(
            dimension_semantics=("parallel",),
        ),
        cost_estimate=cost,
    )(x2, gamma2, beta2)

    results = []
    for h in range(H):
        o = outs[h].reshape(-1)
        if pad:
            o = o[:total]
        results.append(o.reshape(*lead, D))
    return tuple(results)


if __name__ == "__main__":
    key = jax.random.PRNGKey(0)
    k_x, k_g = jax.random.split(key)

    B, S, D, H = 2, 8, 32, 4
    x = jax.random.normal(k_x, (B, S, D), dtype=jnp.float32)

    # Deterministic parameter init matching nn.init.normal_(gamma, std=0.02), beta zeros.
    gamma = 0.02 * jax.random.normal(k_g, (H, D), dtype=jnp.float32)
    beta = jnp.zeros((H, D), dtype=jnp.float32)

    outs = offset_scale(x, gamma, beta)
    outs = jax.block_until_ready(outs)

    # Reference check (pure JAX einsum + broadcast).
    ref = jnp.einsum("...d,hd->...hd", x, gamma) + beta  # (B, S, H, D)
    for h in range(H):
        assert outs[h].shape == (B, S, D)
        assert jnp.allclose(outs[h], ref[..., h, :], atol=1e-6), f"mismatch at head {h}"

    print("KERNEL_OK")
</pallas_src>

<mosaic_0001>
module attributes {stable_mosaic.version = 11 : i64} {
  func.func @_offset_scale_kernel(%arg0: i32, %arg1: memref<8x128xf32, #tpu.memory_space<vmem>>, %arg2: memref<4x128xf32, #tpu.memory_space<vmem>>, %arg3: memref<4x128xf32, #tpu.memory_space<vmem>>, %arg4: memref<8x128xf32, #tpu.memory_space<vmem>>, %arg5: memref<8x128xf32, #tpu.memory_space<vmem>>, %arg6: memref<8x128xf32, #tpu.memory_space<vmem>>, %arg7: memref<8x128xf32, #tpu.memory_space<vmem>>) attributes {dimension_semantics = [#tpu.dimension_semantics<parallel>], iteration_bounds = array<i64: 1>, scalar_prefetch = 0 : i64, scratch_operands = 0 : i64, tpu.core_type = #tpu.core_type<tc>, window_params = [{transform_indices = @transform_0, window_bounds = array<i64: 8, 128>}, {pipeline_mode = #tpu.pipeline_mode<synchronous>, transform_indices = @transform_1, window_bounds = array<i64: 4, 128>}, {pipeline_mode = #tpu.pipeline_mode<synchronous>, transform_indices = @transform_2, window_bounds = array<i64: 4, 128>}, {transform_indices = @transform_3, window_bounds = array<i64: 8, 128>}, {transform_indices = @transform_4, window_bounds = array<i64: 8, 128>}, {transform_indices = @transform_5, window_bounds = array<i64: 8, 128>}, {transform_indices = @transform_6, window_bounds = array<i64: 8, 128>}]} {
    %c0 = arith.constant 0 : index
    %c0_0 = arith.constant 0 : index
    %0 = vector.load %arg1[%c0, %c0_0] : memref<8x128xf32, #tpu.memory_space<vmem>>, vector<8x128xf32>
    %c0_1 = arith.constant 0 : index
    %c0_2 = arith.constant 0 : index
    %1 = vector.load %arg2[%c0_1, %c0_2] : memref<4x128xf32, #tpu.memory_space<vmem>>, vector<1x128xf32>
    %c0_3 = arith.constant 0 : index
    %c0_4 = arith.constant 0 : index
    %2 = vector.load %arg3[%c0_3, %c0_4] : memref<4x128xf32, #tpu.memory_space<vmem>>, vector<1x128xf32>
    %3 = vector.broadcast %1 : vector<1x128xf32> to vector<8x128xf32>
    %4 = arith.mulf %0, %3 : vector<8x128xf32>
    %5 = vector.broadcast %2 : vector<1x128xf32> to vector<8x128xf32>
    %6 = arith.addf %4, %5 : vector<8x128xf32>
    %c0_5 = arith.constant 0 : index
    %c0_6 = arith.constant 0 : index
    %7 = vector.load %arg4[%c0_5, %c0_6] : memref<8x128xf32, #tpu.memory_space<vmem>>, vector<8x128xf32>
    tpu.vector_store %arg4[%c0_5, %c0_6], %6 {strides = array<i32>} : memref<8x128xf32, #tpu.memory_space<vmem>>, vector<8x128xf32>,
    %c1 = arith.constant 1 : index
    %c0_7 = arith.constant 0 : index
    %8 = vector.load %arg2[%c1, %c0_7] : memref<4x128xf32, #tpu.memory_space<vmem>>, vector<1x128xf32>
    %c1_8 = arith.constant 1 : index
    %c0_9 = arith.constant 0 : index
    %9 = vector.load %arg3[%c1_8, %c0_9] : memref<4x128xf32, #tpu.memory_space<vmem>>, vector<1x128xf32>
    %10 = vector.broadcast %8 : vector<1x128xf32> to vector<8x128xf32>
    %11 = arith.mulf %0, %10 : vector<8x128xf32>
    %12 = vector.broadcast %9 : vector<1x128xf32> to vector<8x128xf32>
    %13 = arith.addf %11, %12 : vector<8x128xf32>
    %c0_10 = arith.constant 0 : index
    %c0_11 = arith.constant 0 : index
    %14 = vector.load %arg5[%c0_10, %c0_11] : memref<8x128xf32, #tpu.memory_space<vmem>>, vector<8x128xf32>
    tpu.vector_store %arg5[%c0_10, %c0_11], %13 {strides = array<i32>} : memref<8x128xf32, #tpu.memory_space<vmem>>, vector<8x128xf32>,
    %c2 = arith.constant 2 : index
    %c0_12 = arith.constant 0 : index
    %15 = vector.load %arg2[%c2, %c0_12] : memref<4x128xf32, #tpu.memory_space<vmem>>, vector<1x128xf32>
    %c2_13 = arith.constant 2 : index
    %c0_14 = arith.constant 0 : index
    %16 = vector.load %arg3[%c2_13, %c0_14] : memref<4x128xf32, #tpu.memory_space<vmem>>, vector<1x128xf32>
    %17 = vector.broadcast %15 : vector<1x128xf32> to vector<8x128xf32>
    %18 = arith.mulf %0, %17 : vector<8x128xf32>
    %19 = vector.broadcast %16 : vector<1x128xf32> to vector<8x128xf32>
    %20 = arith.addf %18, %19 : vector<8x128xf32>
    %c0_15 = arith.constant 0 : index
    %c0_16 = arith.constant 0 : index
    %21 = vector.load %arg6[%c0_15, %c0_16] : memref<8x128xf32, #tpu.memory_space<vmem>>, vector<8x128xf32>
    tpu.vector_store %arg6[%c0_15, %c0_16], %20 {strides = array<i32>} : memref<8x128xf32, #tpu.memory_space<vmem>>, vector<8x128xf32>,
    %c3 = arith.constant 3 : index
    %c0_17 = arith.constant 0 : index
    %22 = vector.load %arg2[%c3, %c0_17] : memref<4x128xf32, #tpu.memory_space<vmem>>, vector<1x128xf32>
    %c3_18 = arith.constant 3 : index
    %c0_19 = arith.constant 0 : index
    %23 = vector.load %arg3[%c3_18, %c0_19] : memref<4x128xf32, #tpu.memory_space<vmem>>, vector<1x128xf32>
    %24 = vector.broadcast %22 : vector<1x128xf32> to vector<8x128xf32>
    %25 = arith.mulf %0, %24 : vector<8x128xf32>
    %26 = vector.broadcast %23 : vector<1x128xf32> to vector<8x128xf32>
    %27 = arith.addf %25, %26 : vector<8x128xf32>
    %c0_20 = arith.constant 0 : index
    %c0_21 = arith.constant 0 : index
    %28 = vector.load %arg7[%c0_20, %c0_21] : memref<8x128xf32, #tpu.memory_space<vmem>>, vector<8x128xf32>
    tpu.vector_store %arg7[%c0_20, %c0_21], %27 {strides = array<i32>} : memref<8x128xf32, #tpu.memory_space<vmem>>, vector<8x128xf32>,
    return
  }
  func.func @transform_0(%arg0: i32) -> (i32, i32) {
    %c0_i32 = arith.constant 0 : i32
    %c0_i32_0 = arith.constant 0 : i32
    return %arg0, %c0_i32 : i32, i32
  }
  func.func @transform_1(%arg0: i32) -> (i32, i32) {
    %c0_i32 = arith.constant 0 : i32
    %c0_i32_0 = arith.constant 0 : i32
    %c0_i32_1 = arith.constant 0 : i32
    return %c0_i32, %c0_i32_0 : i32, i32
  }
  func.func @transform_2(%arg0: i32) -> (i32, i32) {
    %c0_i32 = arith.constant 0 : i32
    %c0_i32_0 = arith.constant 0 : i32
    %c0_i32_1 = arith.constant 0 : i32
    return %c0_i32, %c0_i32_0 : i32, i32
  }
  func.func @transform_3(%arg0: i32) -> (i32, i32) {
    %c0_i32 = arith.constant 0 : i32
    %c0_i32_0 = arith.constant 0 : i32
    return %arg0, %c0_i32 : i32, i32
  }
  func.func @transform_4(%arg0: i32) -> (i32, i32) {
    %c0_i32 = arith.constant 0 : i32
    %c0_i32_0 = arith.constant 0 : i32
    return %arg0, %c0_i32 : i32, i32
  }
  func.func @transform_5(%arg0: i32) -> (i32, i32) {
    %c0_i32 = arith.constant 0 : i32
    %c0_i32_0 = arith.constant 0 : i32
    return %arg0, %c0_i32 : i32, i32
  }
  func.func @transform_6(%arg0: i32) -> (i32, i32) {
    %c0_i32 = arith.constant 0 : i32
    %c0_i32_0 = arith.constant 0 : i32
    return %arg0, %c0_i32 : i32, i32
  }
}

</mosaic_0001>

<bundles_post_ra>
// kernel: tpu_custom_call.1
= control target key start
LH: loop header
LB: loop body
LE: loop exit
PB: predicated region body
PF: predicated region fallthrough
CT: control target
= control target key end

     0   :  { %12 = vsyncpa [#allocation3], 0  ;;  %s401_s0 = inlined_call_operand.hbm [shape: f32[8,128], index: 0, kind: input, shape index: {}]   ;;  %s402_s1 = inlined_call_operand.hbm [shape: f32[4,128], index: 1, kind: input, shape index: {}]   ;;  %s403_s2 = inlined_call_operand.hbm [shape: f32[4,128], index: 2, kind: input, shape index: {}]   ;;  %s404_s3 = inlined_call_operand.hbm [shape: f32[8,128], index: 3, kind: output, shape index: {0}]   ;;  %s405_s4 = inlined_call_operand.hbm [shape: f32[8,128], index: 4, kind: output, shape index: {1}]   ;;  %s406_s5 = inlined_call_operand.hbm [shape: f32[8,128], index: 5, kind: output, shape index: {2}]   ;;  %s407_s6 = inlined_call_operand.hbm [shape: f32[8,128], index: 6, kind: output, shape index: {3}]  }
   0x1   :  { %13 = vsyncpa [#allocation6], 0 }
   0x2   :  { %14 = vsyncpa [#allocation4], 0 }
   0x3   :  { %15 = vsyncpa [#allocation10], 0 }
   0x4   :  { %16 = vsyncpa [#allocation13], 0  ;;  %s331_s21 = smov [#allocation5]   ;;  %s332_s23 = smov [#allocation2]  }
   0x5   :  { %s33_s22 = sshll.u32 %s331_s21, 4  ;;  %s23_s24 = sshll.u32 %s332_s23, 4  ;;  %s34_s22 = int_to_ptr.vmem [resolvable:$true] %s33_s22  ;;  %s24_s24 = int_to_ptr.vmem [resolvable:$true] %s23_s24 }
   0x6   :  { %s189_s25 = scalar_lea.vmem %s34_s22, 64  ;;  %p194_p1 = scmp.lt.s32.totalorder %s34_s22, %s34_s22 }
   0x7   :  { %p190_p0 = scmp.ne.s32.totalorder %s34_s22, %s189_s25  ;;  %p195_p2 = scmp.lt.s32.totalorder %s189_s25, %s189_s25 }
   0x9   :  { %p196_p3 = por %p195_p2, %p194_p1 }
   0xb   :  { %p197_p4 = pnand %p196_p3, %p190_p0 }
   0xd   :  { %200 = shalt.err (!%p197_p4)
}
   0xe   :  { %36 = dma.hbm_to_vmem [thread:$0]  %s402_s1, 64, %s34_s22, [#allocation6]  }
   0xf   :  { %s209_s28 = scalar_lea.vmem %s24_s24, 128  ;;  %p214_p6 = scmp.lt.s32.totalorder %s24_s24, %s24_s24 }
  0x10   :  { %p210_p5 = scmp.ne.s32.totalorder %s24_s24, %s209_s28  ;;  %p215_p7 = scmp.lt.s32.totalorder %s209_s28, %s209_s28 }
  0x12   :  { %p216_p8 = por %p215_p7, %p214_p6 }
  0x14   :  { %p217_p9 = pnand %p216_p8, %p210_p5 }
  0x16   :  { %220 = shalt.err (!%p217_p9)
}
  0x17   :  { %26 = dma.hbm_to_vmem [thread:$0]  %s401_s0, 128, %s24_s24, [#allocation3]  }
  0x18   :  { %s333_s7 = smov [#allocation7]  }
  0x19   :  { %s43_s8 = sshll.u32 %s333_s7, 4  ;;  %s44_s8 = int_to_ptr.vmem [resolvable:$true] %s43_s8 }
  0x1a   :  { %s229_s9 = scalar_lea.vmem %s44_s8, 64  ;;  %p234_p11 = scmp.lt.s32.totalorder %s44_s8, %s44_s8 }
  0x1b   :  { %p230_p10 = scmp.ne.s32.totalorder %s44_s8, %s229_s9  ;;  %p235_p12 = scmp.lt.s32.totalorder %s229_s9, %s229_s9 }
  0x1d   :  { %p236_p13 = por %p235_p12, %p234_p11 }
  0x1f   :  { %p237_p0 = pnand %p236_p13, %p230_p10 }
  0x21   :  { %240 = shalt.err (!%p237_p0)
}
  0x22   :  { %46 = dma.hbm_to_vmem [thread:$0]  %s403_s2, 64, %s44_s8, [#allocation6]  }
  0x23   :  { %321 = dma.done.wait [#allocation3], 128  }
  0x24   :  { %322 = vsyncadd [#allocation3], 4294967168 }
  0x25   :  { %323 = dma.done.wait [#allocation6], 128  }
  0x26   :  { %324 = vsyncadd [#allocation6], 4294967168  ;;  %s334_s11 = smov [#allocation9]   ;;  %s335_s12 = smov [#allocation8]   ;;  %v56_v0 = vld [vmem:[#allocation2] sm:$0xff] }
  0x27   :  { %s125_s0 = sshll.u32 %s334_s11, 4  ;;  %s115_s13 = sshll.u32 %s335_s12, 4  ;;  %v168_v1 = vld [vmem:[#allocation5 + $0x1] ss:$0 sm:$0xff]  ;;  %v169_v2 = vld [vmem:[#allocation7 + $0x1] ss:$0 sm:$0xff]  ;;  %s126_s0 = int_to_ptr.vmem [resolvable:$true] %s125_s0  ;;  %s116_s13 = int_to_ptr.vmem [resolvable:$true] %s115_s13 }
  0x28   :  { %s336_s14 = smov [#allocation11]   ;;  %s337_s16 = smov [#allocation12]   ;;  %v76_v3 = vmul.f32 %v168_v1, %v56_v0  ;;  %v166_v4 = vld [vmem:[#allocation5] ss:$0 sm:$0xff]  ;;  %v167_v5 = vld [vmem:[#allocation7] ss:$0 sm:$0xff] }
  0x29   :  { %s135_s15 = sshll.u32 %s336_s14, 4  ;;  %s145_s17 = sshll.u32 %s337_s16, 4  ;;  %v170_v6 = vld [vmem:[#allocation5 + $0x2] ss:$0 sm:$0xff]  ;;  %v63_v7 = vmul.f32 %v166_v4, %v56_v0  ;;  %v171_v8 = vld [vmem:[#allocation7 + $0x2] ss:$0 sm:$0xff]  ;;  %s136_s15 = int_to_ptr.vmem [resolvable:$true] %s135_s15  ;;  %s382_s17 = int_to_ptr.vmem [resolvable:$true] %s145_s17 }
  0x2a   :  { %v89_v9 = vmul.f32 %v170_v6, %v56_v0  ;;  %v172_v10 = vld [vmem:[#allocation5 + $0x3] ss:$0 sm:$0xff]  ;;  %v173_v11 = vld [vmem:[#allocation7 + $0x3] ss:$0 sm:$0xff]  ;;  %v81_v12 = vadd.f32 %v169_v2, %v76_v3  ;;  %s241_s2 = scalar_lea.vmem %s126_s0, 128  ;;  %p246_p2 = scmp.lt.s32.totalorder %s126_s0, %s126_s0 }
  0x2b   :  { %v102_v13 = vmul.f32 %v172_v10, %v56_v0  ;;  %v68_v14 = vadd.f32 %v167_v5, %v63_v7  ;;  %p242_p1 = scmp.ne.s32.totalorder %s126_s0, %s241_s2  ;;  %p247_p3 = scmp.lt.s32.totalorder %s241_s2, %s241_s2 }
  0x2c   :  { %v94_v15 = vadd.f32 %v171_v8, %v89_v9  ;;  %82 = vst [vmem:[#allocation9] sm:$0xff] %v81_v12 }
  0x2d   :  { %v107_v16 = vadd.f32 %v173_v11, %v102_v13  ;;  %69 = vst [vmem:[#allocation8] sm:$0xff] %v68_v14  ;;  %p248_p4 = por %p247_p3, %p246_p2 }
  0x2e   :  { %95 = vst [vmem:[#allocation11] sm:$0xff] %v94_v15 }
  0x2f   :  { %p249_p5 = pnand %p248_p4, %p242_p1 }
  0x31   :  { %252 = shalt.err (!%p249_p5)
}
  0x32   :  { %128 = dma.vmem_to_hbm [thread:$0]  %s126_s0, 128, %s405_s4, [#allocation10]   ;;  %108 = vst [vmem:[#allocation12] sm:$0xff] %v107_v16 }
  0x33   :  { %s261_s20 = scalar_lea.vmem %s116_s13, 128  ;;  %p266_p7 = scmp.lt.s32.totalorder %s116_s13, %s116_s13 }
  0x34   :  { %p262_p6 = scmp.ne.s32.totalorder %s116_s13, %s261_s20  ;;  %p267_p8 = scmp.lt.s32.totalorder %s261_s20, %s261_s20 }
  0x36   :  { %p268_p9 = por %p267_p8, %p266_p7 }
  0x38   :  { %p269_p10 = pnand %p268_p9, %p262_p6 }
  0x3a   :  { %272 = shalt.err (!%p269_p10)
}
  0x3b   :  { %118 = dma.vmem_to_hbm [thread:$0]  %s116_s13, 128, %s404_s3, [#allocation4]  }
  0x3c   :  { %s281_s23 = scalar_lea.vmem %s136_s15, 128  ;;  %p286_p12 = scmp.lt.s32.totalorder %s136_s15, %s136_s15 }
  0x3d   :  { %p282_p11 = scmp.ne.s32.totalorder %s136_s15, %s281_s23  ;;  %p287_p13 = scmp.lt.s32.totalorder %s281_s23, %s281_s23 }
  0x3f   :  { %p288_p0 = por %p287_p13, %p286_p12 }
  0x41   :  { %p289_p1 = pnand %p288_p0, %p282_p11 }
  0x43   :  { %292 = shalt.err (!%p289_p1)
}
  0x44   :  { %138 = dma.vmem_to_hbm [thread:$0]  %s136_s15, 128, %s406_s5, [#allocation10]  }
  0x45   :  { %s301_s25 = scalar_lea.vmem %s382_s17, 128  ;;  %p306_p3 = scmp.lt.s32.totalorder %s382_s17, %s382_s17 }
  0x46   :  { %p302_p2 = scmp.ne.s32.totalorder %s382_s17, %s301_s25  ;;  %p307_p4 = scmp.lt.s32.totalorder %s301_s25, %s301_s25 }
  0x48   :  { %p308_p5 = por %p307_p4, %p306_p3 }
  0x4a   :  { %p309_p6 = pnand %p308_p5, %p302_p2 }
  0x4c   :  { %312 = shalt.err (!%p309_p6)
}
  0x4d   :  { %148 = dma.vmem_to_hbm [thread:$0]  %s382_s17, 128, %s407_s6, [#allocation13]  }
  0x4e   :  { %325 = dma.done.wait [#allocation4], 128  }
  0x4f   :  { %326 = vsyncadd [#allocation4], 4294967168 }
  0x50   :  { %327 = dma.done.wait [#allocation10], 256  }
  0x51   :  { %328 = vsyncadd [#allocation10], 4294967040 }
  0x52   :  { %329 = dma.done.wait [#allocation13], 128  }
  0x53   :  { %330 = vsyncadd [#allocation13], 4294967168 }
  0x54   :  { %161 = vsyncpa [#allocation3], 1 }
  0x55   :  { %162 = vsyncpa [#allocation6], 1 }
  0x56   :  { %163 = vsyncpa [#allocation4], 1 }
  0x57   :  { %164 = vsyncpa [#allocation10], 1 }
  0x58   :  { %165 = vsyncpa [#allocation13], 1 }

</bundles_post_ra>
